<compile_context>
chip_gen: v6e
topology: v6e:2x2x1
jax: 0.10.0
libtpu: 0.0.40
codegen_flags: <defaults>
</compile_context>

<pallas_src>
import functools

import numpy as np
import jax
import jax.numpy as jnp
from jax import lax
from jax.experimental import pallas as pl
from jax.experimental.pallas import tpu as pltpu

_MIB = 1024 * 1024


# ---------------------------------------------------------------------------
# helpers / planning
# ---------------------------------------------------------------------------

def _resample_indices(dim: int, size: int) -> np.ndarray:
    # torch.LongTensor(np.linspace(0, dim, size, endpoint=False)) truncates
    # toward zero == floor for the non-negative values produced here.
    return np.linspace(0, dim, size, endpoint=False).astype(np.int64)


def _pad_bytes(rows: int, cols: int, dtype) -> int:
    """VMEM bytes of a (rows, cols) block including (sublane, lane) tiling padding."""
    isz = jnp.dtype(dtype).itemsize
    sub = max(8, 32 // isz)                      # 8 (f32) / 16 (bf16) / 32 (int8)
    r = -(-rows // sub) * sub
    c = -(-cols // 128) * 128
    return r * c * isz


def _vmem_capacity_bytes():
    try:
        info = pltpu.get_tpu_info()
    except Exception:
        return None
    for name in ("vmem_capacity_bytes", "vmem_bytes", "vmem_size_bytes"):
        val = getattr(info, name, None)
        if isinstance(val, (int, np.integer)) and int(val) > 0:
            return int(val)
    return None


def _vmem_policy():
    """(per-step VMEM budget, vmem_limit_bytes, prefer_multi_step) by generation."""
    cap = _vmem_capacity_bytes()
    if cap is not None and cap >= 100 * _MIB:      # v5e / v6e: 128 MiB VMEM, 1 TC
        return 48 * _MIB, 96 * _MIB, False
    if cap is not None:                            # v7x: 64 MiB VMEM, 2 TCs
        return 16 * _MIB, 32 * _MIB, True
    return 16 * _MIB, 32 * _MIB, False             # unknown: conservative


def _choose_tb(B, fitting, prefer_multi, tiny):
    """Pick images-per-step among fitting divisors of B."""
    if prefer_multi and not tiny:
        # v7x: bias toward an even grid-0 step count >= 4 so both TCs stay busy.
        for pred in (lambda d: (B // d) >= 4 and (B // d) % 2 == 0,
                     lambda d: (B // d) >= 2 and (B // d) % 2 == 0):
            cand = [d for d in fitting if pred(d)]
            if cand:
                return max(cand)
    # Single-TC chips / tiny problems: biggest block, fewest 0.35us grid steps.
    return max(fitting)


def _chunk_candidates(k_total):
    """Multiples of 128 that divide k_total, descending (largest first)."""
    start = k_total - (k_total % 128)
    return [k for k in range(start, 0, -128) if k_total % k == 0]


def _plan_fast(B, size, keff, dtype, sel_dtype, budget, prefer_multi, tiny):
    """Returns (tb, k_chunk, n_k) for the fast path."""
    def vmem(tb, kc):
        tm = tb * size
        return (2 * _pad_bytes(tm, kc, dtype)          # input block  (double buffered)
                + 2 * _pad_bytes(tm, size, dtype)      # output block (double buffered)
                + _pad_bytes(kc, size, sel_dtype)      # in-kernel selection matrix
                + _pad_bytes(tm, size, jnp.float32))   # f32 matmul result

    divisors = [d for d in range(1, B + 1) if B % d == 0]
    legal = [d for d in divisors if d == B or (d * size) % 8 == 0]

    fitting = [d for d in legal if vmem(d, keff) <= budget]
    if fitting:
        return _choose_tb(B, fitting, prefer_multi, tiny), keff, 1

    # Nothing fits with the full contraction: chunk the lane dimension.
    tb = min(legal)
    cands = _chunk_candidates(keff)
    for kc in cands:
        if vmem(tb, kc) <= budget:
            return tb, kc, keff // kc
    if cands:                                   # smallest legal chunk, best effort
        return tb, cands[-1], keff // cands[-1]
    return tb, keff, 1                          # cannot chunk legally, best effort


def _plan_general(B, H, W, size, dtype, sel_dtype, budget, prefer_multi, tiny):
    """Returns (tb, w_chunk, n_w) for the general path."""
    def vmem(tb, wc):
        return (2 * _pad_bytes(tb * H, wc, dtype)
                + 2 * _pad_bytes(tb * size, size, dtype)
                + _pad_bytes(size, H, sel_dtype)
                + _pad_bytes(wc, size, sel_dtype)
                + _pad_bytes(size, wc, jnp.float32)     # row-gathered temporary
                + _pad_bytes(size, size, jnp.float32))

    divisors = [d for d in range(1, B + 1) if B % d == 0]
    legal = [d for d in divisors
             if d == B or ((d * H) % 8 == 0 and (d * size) % 8 == 0)]
    # Cap the statically unrolled per-image loop to bound vreg live ranges.
    capped = [d for d in legal if d <= 8] or [min(legal)]

    fitting = [d for d in capped if vmem(d, W) <= budget]
    if fitting:
        return _choose_tb(B, fitting, prefer_multi, tiny), W, 1

    tb = min(capped)
    cands = _chunk_candidates(W)
    for wc in cands:
        if vmem(tb, wc) <= budget:
            return tb, wc, W // wc
    if cands:
        return tb, cands[-1], W // cands[-1]
    return tb, W, 1


# ---------------------------------------------------------------------------
# kernels
# ---------------------------------------------------------------------------

def _fast_kernel(x_ref, o_ref, *, w_in, size, k_chunk, n_k, sel_dtype):
    """Row-gathered slab -> column gather via in-kernel one-hot matmul.

    x_ref: (tb*size, k_chunk) = lanes [k0, k0+k_chunk) of the row-gathered view.
    o_ref: (tb*size, size).
    sel[k, j] = 1 iff k0 + k == floor(j * w_in / size); this simultaneously
    masks away non-selected H rows packed after the first w_in lanes (full-row
    variant) and performs the W gather.
    """
    k0 = pl.program_id(1) * k_chunk
    gk = k0 + lax.broadcasted_iota(jnp.int32, (k_chunk, size), 0)
    jw = lax.broadcasted_iota(jnp.int32, (k_chunk, size), 1) * w_in
    sel = ((gk * size <= jw) & (jw < (gk + 1) * size)).astype(sel_dtype)

    part = jnp.dot(x_ref[...], sel, preferred_element_type=jnp.float32)

    if n_k == 1:
        o_ref[...] = part.astype(o_ref.dtype)
    else:
        # One-hot columns => each output element gets exactly one non-zero
        # contribution across K chunks, so the accumulation is exact.
        @pl.when(pl.program_id(1) == 0)
        def _():
            o_ref[...] = part.astype(o_ref.dtype)

        @pl.when(pl.program_id(1) != 0)
        def _():
            o_ref[...] += part.astype(o_ref.dtype)


def _general_kernel(x_ref, o_ref, *, h, w_in, size, w_chunk, tb, sel_dtype):
    """General path (H % size != 0): per-image row + column one-hot matmuls.

    x_ref: (tb*h, w_chunk); o_ref: (tb*size, size), accumulated over the W axis.
    """
    wk = pl.program_id(1)

    # Row-selection one-hot (size, h): sel_h[i, k] = (k == floor(i*h/size)).
    ih = lax.broadcasted_iota(jnp.int32, (size, h), 0) * h
    kh = lax.broadcasted_iota(jnp.int32, (size, h), 1)
    sel_h = ((kh * size <= ih) & (ih < (kh + 1) * size)).astype(sel_dtype)

    # Column-selection one-hot for this W chunk (w_chunk, size).
    gk = wk * w_chunk + lax.broadcasted_iota(jnp.int32, (w_chunk, size), 0)
    jw = lax.broadcasted_iota(jnp.int32, (w_chunk, size), 1) * w_in
    sel_w = ((gk * size <= jw) & (jw < (gk + 1) * size)).astype(sel_dtype)

    @pl.when(wk == 0)
    def _():
        o_ref[...] = jnp.zeros_like(o_ref)

    # tb is small and static (<= 8 unless legality forces tb == B) -> unrolled.
    for t in range(tb):
        xt = x_ref[t * h:(t + 1) * h, :]                                    # (h, wc)
        rt = jnp.dot(sel_h, xt, preferred_element_type=jnp.float32)         # (size, wc)
        yt = jnp.dot(rt.astype(x_ref.dtype), sel_w,
                     preferred_element_type=jnp.float32)                    # (size, size)
        o_ref[t * size:(t + 1) * size, :] += yt.astype(o_ref.dtype)


# ---------------------------------------------------------------------------
# wrapper
# ---------------------------------------------------------------------------

@functools.partial(jax.jit, static_argnames=("size",))
def resample(x: jax.Array, size: int = 256) -> jax.Array:
    """Pallas equivalent of Resample(size).forward(x) for NCHW float input."""
    N, C, H, W = x.shape
    B = N * C
    isz = jnp.dtype(x.dtype).itemsize
    sel_dtype = jnp.bfloat16 if x.dtype == jnp.bfloat16 else jnp.float32

    budget, vmem_limit, prefer_multi = _vmem_policy()
    tiny = (B * H * W + B * size * size) * isz < 2 * _MIB

    out_shape2 = jax.ShapeDtypeStruct((B * size, size), x.dtype)

    rh = H // size if (size > 0 and H % size == 0) else 0
    if rh >= 1:
        # --- fast path: H rows gathered at DMA time ---------------------------
        narrow = (W % 128 == 0) or (rh == 1)    # copy only the first W lanes
        keff = W if narrow else rh * W          # else full row, sel zero-pads rows >= W
        x2 = x.reshape(B * size, rh * W)

        tb, kc, n_k = _plan_fast(B, size, keff, x.dtype, sel_dtype,
                                 budget, prefer_multi, tiny)
        tm = tb * size
        grid = (B // tb, n_k)

        kernel = functools.partial(_fast_kernel, w_in=W, size=size,
                                   k_chunk=kc, n_k=n_k, sel_dtype=sel_dtype)
        flops = 2 * B * size * keff * size
        bytes_acc = B * size * keff * isz + B * size * size * isz

        out2 = pl.pallas_call(
            kernel,
            out_shape=out_shape2,
            grid_spec=pltpu.PrefetchScalarGridSpec(
                num_scalar_prefetch=0,
                grid=grid,
                in_specs=[pl.BlockSpec((tm, kc), lambda m, k: (m, k))],
                out_specs=pl.BlockSpec((tm, size), lambda m, k: (m, 0)),
            ),
            compiler_params=pltpu.CompilerParams(
                dimension_semantics=("parallel", "arbitrary"),
                vmem_limit_bytes=vmem_limit),
            cost_estimate=pl.CostEstimate(
                flops=flops, transcendentals=0, bytes_accessed=bytes_acc),
        )(x2)
    else:
        # --- general path (H % size != 0, incl. upsampling) -------------------
        x2 = x.reshape(B * H, W)
        tb, wc, n_w = _plan_general(B, H, W, size, x.dtype, sel_dtype,
                                    budget, prefer_multi, tiny)
        grid = (B // tb, n_w)

        kernel = functools.partial(_general_kernel, h=H, w_in=W, size=size,
                                   w_chunk=wc, tb=tb, sel_dtype=sel_dtype)
        flops = 2 * B * size * H * W + 2 * B * size * W * size
        bytes_acc = B * H * W * isz + B * size * size * isz

        out2 = pl.pallas_call(
            kernel,
            out_shape=out_shape2,
            grid_spec=pltpu.PrefetchScalarGridSpec(
                num_scalar_prefetch=0,
                grid=grid,
                in_specs=[pl.BlockSpec((tb * H, wc), lambda b, w: (b, w))],
                out_specs=pl.BlockSpec((tb * size, size), lambda b, w: (b, 0)),
            ),
            compiler_params=pltpu.CompilerParams(
                dimension_semantics=("parallel", "arbitrary"),
                vmem_limit_bytes=vmem_limit),
            cost_estimate=pl.CostEstimate(
                flops=flops, transcendentals=0, bytes_accessed=bytes_acc),
        )(x2)

    return out2.reshape(N, C, size, size)


# ---------------------------------------------------------------------------
# reference + self-test
# ---------------------------------------------------------------------------

def _reference(x: jax.Array, size: int) -> jax.Array:
    ids_h = jnp.asarray(_resample_indices(x.shape[2], size))
    ids_w = jnp.asarray(_resample_indices(x.shape[3], size))
    return x[:, :, ids_h, :][:, :, :, ids_w]


if __name__ == "__main__":
    key = jax.random.PRNGKey(0)

    configs = [
        # (N, C, H, W, size)
        (2, 4, 16, 16, 8),    # primary spec shapes -> extended fast path (unaligned W)
        (1, 2, 16, 128, 8),   # narrow DMA row-gather fast path (W % 128 == 0)
        (1, 2, 6, 16, 8),     # H % size != 0 -> general path (repeated row indices)
        (1, 1, 8, 8, 16),     # upsampling (size > H, W) -> general path
    ]

    for idx, (N, C, H, W, size) in enumerate(configs):
        key, sub = jax.random.split(key)
        x = jax.random.normal(sub, (N, C, H, W), dtype=jnp.float32)

        y = jax.block_until_ready(resample(x, size=size))
        y_ref = _reference(x, size)

        assert y.shape == (N, C, size, size), (idx, y.shape)
        assert jnp.allclose(y, y_ref), f"Pallas resample mismatch vs reference (config {idx})"

    print("KERNEL_OK")
</pallas_src>

<mosaic_0001>
module attributes {stable_mosaic.version = 11 : i64} {
  func.func @_fast_kernel(%arg0: i32, %arg1: i32, %arg2: memref<64x32xf32, #tpu.memory_space<vmem>>, %arg3: memref<64x8xf32, #tpu.memory_space<vmem>>) attributes {dimension_semantics = [#tpu.dimension_semantics<parallel>, #tpu.dimension_semantics<arbitrary>], iteration_bounds = array<i64: 1, 1>, scalar_prefetch = 0 : i64, scratch_operands = 0 : i64, tpu.core_type = #tpu.core_type<tc>, window_params = [{transform_indices = @transform_0, window_bounds = array<i64: 64, 32>}, {transform_indices = @transform_1, window_bounds = array<i64: 64, 8>}]} {
    %c32_i32 = arith.constant 32 : i32
    %0 = arith.muli %arg1, %c32_i32 : i32
    %1 = tpu.iota {dimensions = array<i32: 0>} : vector<32x8xi32>
    %2 = vector.broadcast %0 : i32 to vector<32x8xi32>
    %3 = arith.addi %2, %1 : vector<32x8xi32>
    %4 = tpu.iota {dimensions = array<i32: 1>} : vector<32x8xi32>
    %c16_i32 = arith.constant 16 : i32
    %5 = vector.broadcast %c16_i32 : i32 to vector<32x8xi32>
    %6 = arith.muli %4, %5 : vector<32x8xi32>
    %c8_i32 = arith.constant 8 : i32
    %7 = vector.broadcast %c8_i32 : i32 to vector<32x8xi32>
    %8 = arith.muli %3, %7 : vector<32x8xi32>
    %9 = arith.cmpi sle, %8, %6 : vector<32x8xi32>
    %c1_i32 = arith.constant 1 : i32
    %10 = vector.broadcast %c1_i32 : i32 to vector<32x8xi32>
    %11 = arith.addi %3, %10 : vector<32x8xi32>
    %c8_i32_0 = arith.constant 8 : i32
    %12 = vector.broadcast %c8_i32_0 : i32 to vector<32x8xi32>
    %13 = arith.muli %11, %12 : vector<32x8xi32>
    %14 = arith.cmpi slt, %6, %13 : vector<32x8xi32>
    %15 = arith.andi %9, %14 : vector<32x8xi1>
    %16 = arith.extui %15 : vector<32x8xi1> to vector<32x8xi32>
    %17 = arith.sitofp %16 : vector<32x8xi32> to vector<32x8xf32>
    %c0 = arith.constant 0 : index
    %c0_1 = arith.constant 0 : index
    %18 = vector.load %arg2[%c0, %c0_1] : memref<64x32xf32, #tpu.memory_space<vmem>>, vector<64x32xf32>
    %cst = arith.constant dense<0.000000e+00> : vector<64x8xf32>
    %19 = tpu.matmul %18, %17, %cst {dimension_numbers = #tpu.dot_dimension_numbers<[1], [0], [0], [1], [0, 0, 1, 1], [], []>} : vector<64x32xf32>, vector<32x8xf32>, vector<64x8xf32> -> vector<64x8xf32>
    %c0_2 = arith.constant 0 : index
    %c0_3 = arith.constant 0 : index
    %20 = vector.load %arg3[%c0_2, %c0_3] : memref<64x8xf32, #tpu.memory_space<vmem>>, vector<64x8xf32>
    tpu.vector_store %arg3[%c0_2, %c0_3], %19 {strides = array<i32>} : memref<64x8xf32, #tpu.memory_space<vmem>>, vector<64x8xf32>,
    return
  }
  func.func @transform_0(%arg0: i32, %arg1: i32) -> (i32, i32) {
    %c0_i32 = arith.constant 0 : i32
    return %arg0, %arg1 : i32, i32
  }
  func.func @transform_1(%arg0: i32, %arg1: i32) -> (i32, i32) {
    %c0_i32 = arith.constant 0 : i32
    %c0_i32_0 = arith.constant 0 : i32
    return %arg0, %c0_i32 : i32, i32
  }
}

</mosaic_0001>

<bundles_post_ra>
// kernel: resample.1
= control target key start
LH: loop header
LB: loop body
LE: loop exit
PB: predicated region body
PF: predicated region fallthrough
CT: control target
= control target key end

     0   :  { %v10_v0 = vlaneseq  ;;  %vm63_vm0 = vcmask 261120   ;;  %s357_s0 = inlined_call_operand.vmem [shape: f32[64,32], index: 0, kind: input, shape index: {}]   ;;  %s358_s1 = inlined_call_operand.hbm [shape: f32[64,8], index: 1, kind: output, shape index: {}]  }
   0x1   :  { %v55_v1 = vld [vmem:[%s357_s0] sm:$0xff] }
   0x2   :  { %v59_v2 = vld [vmem:[%s357_s0 + $0x20] sm:$0xff]  ;;  %254 = vmatprep.mubr.msk.f32.mxu0 %vm63_vm0, %v55_v1  ;;  %v11_v3 = vshrl.u32 %v10_v0, 7  ;;  %v21_v4 = vand.u32 127, %v10_v0 }
   0x3   :  { %260 = vmatprep.mubr.msk.f32.mxu1 %vm63_vm0, %v59_v2 }
   0x4   :  { %6 = vsyncpa [#allocation3], 0  ;;  %v14_v5 = vadd.s32 24, %v11_v3  ;;  %v22_v6 = vmul.u32 16, %v21_v4  ;;  %v13_v7 = vadd.s32 16, %v11_v3  ;;  %v12_v8 = vadd.s32 8, %v11_v3 }
   0x5   :  { %v23_v9 = vmul.u32 8, %v11_v3  ;;  %v31_v10 = vadd.s32 1, %v11_v3  ;;  %v300_v21 = vmov 1.0   ;;  %v56_v22 = vld [vmem:[%s357_s0 + $0x8] sm:$0xff]  ;;  %v57_v24 = vld [vmem:[%s357_s0 + $0x10] sm:$0xff]  ;;  %v58_v26 = vld [vmem:[%s357_s0 + $0x18] sm:$0xff] }
   0x6   :  { %v26_v11 = vmul.u32 8, %v14_v5  ;;  %v34_v12 = vadd.s32 1, %v14_v5  ;;  %v25_v13 = vmul.u32 8, %v13_v7  ;;  %v33_v14 = vadd.s32 1, %v13_v7  ;;  %v60_v23 = vld [vmem:[%s357_s0 + $0x28] sm:$0xff]  ;;  %v61_v25 = vld [vmem:[%s357_s0 + $0x30] sm:$0xff] }
   0x7   :  { %v24_v15 = vmul.u32 8, %v12_v8  ;;  %v32_v16 = vadd.s32 1, %v12_v8  ;;  %v35_v17 = vmul.u32 8, %v31_v10  ;;  %vm27_vm9 = vcmp.le.s32.totalorder %v23_v9, %v22_v6  ;;  %v62_v27 = vld [vmem:[%s357_s0 + $0x38] sm:$0xff]  ;;  %s301_s22 = smov [#allocation2]  }
   0x8   :  { %vm30_vm1 = vcmp.le.s32.totalorder %v26_v11, %v22_v6  ;;  %v38_v18 = vmul.u32 8, %v34_v12  ;;  %v37_v19 = vmul.u32 8, %v33_v14  ;;  %vm29_vm2 = vcmp.le.s32.totalorder %v25_v13, %v22_v6  ;;  %s207_s23 = sshll.u32 %s301_s22, 4  ;;  %s208_s23 = int_to_ptr.vmem [resolvable:$true] %s207_s23 }
   0x9   :  { %v36_v20 = vmul.u32 8, %v32_v16  ;;  %vm28_vm5 = vcmp.le.s32.totalorder %v24_v15, %v22_v6  ;;  %vm39_vm10 = vcmp.lt.s32.totalorder %v22_v6, %v35_v17  ;;  %vm193_vm13 = vcmask 64512   ;;  %s278_s0 = scalar_lea.vmem %s208_s23, 1024  ;;  %p283_p1 = scmp.lt.s32.totalorder %s208_s23, %s208_s23 }
   0xa   :  { %vm42_vm3 = vcmp.lt.s32.totalorder %v22_v6, %v38_v18  ;;  %vm41_vm4 = vcmp.lt.s32.totalorder %v22_v6, %v37_v19  ;;  %vm43_vm12 = vmand %vm27_vm9, %vm39_vm10  ;;  %p279_p0 = scmp.ne.s32.totalorder %s208_s23, %s278_s0  ;;  %p284_p2 = scmp.lt.s32.totalorder %s278_s0, %s278_s0 }
   0xb   :  { %vm46_vm6 = vmand %vm30_vm1, %vm42_vm3  ;;  %vm40_vm7 = vcmp.lt.s32.totalorder %v22_v6, %v36_v20 }
   0xc   :  { %246 = vmatprep.subr.msk.mxu0 %vm46_vm6, %v300_v21  ;;  %266 = vmatprep.subr.msk.mxu1 %vm46_vm6, %v300_v21  ;;  %vm45_vm8 = vmand %vm29_vm2, %vm41_vm4  ;;  %p285_p3 = por %p284_p2, %p283_p1 }
   0xd   :  { %247 = vmatpush3.msk.msra.mxu0 %vm46_vm6, %v300_v21  ;;  %270 = vmatpush3.msk.msra.mxu1 %vm46_vm6, %v300_v21  ;;  %vm44_vm11 = vmand %vm28_vm5, %vm40_vm7 }
   0xe   :  { %248 = vmatprep.subr.msk.mxu0 %vm45_vm8, %v300_v21  ;;  %267 = vmatprep.subr.msk.mxu1 %vm45_vm8, %v300_v21  ;;  %p286_p4 = pnand %p285_p3, %p279_p0 }
   0xf   :  { %249 = vmatpush3.msk.msra.mxu0 %vm45_vm8, %v300_v21  ;;  %271 = vmatpush3.msk.msra.mxu1 %vm45_vm8, %v300_v21 }
  0x10   :  { %250 = vmatprep.subr.msk.mxu0 %vm44_vm11, %v300_v21  ;;  %268 = vmatprep.subr.msk.mxu1 %vm44_vm11, %v300_v21 }
  0x11   :  { %251 = vmatpush3.msk.msra.mxu0 %vm44_vm11, %v300_v21  ;;  %272 = vmatpush3.msk.msra.mxu1 %vm44_vm11, %v300_v21 }
  0x12   :  { %252 = vmatprep.subr.msk.mxu0 %vm43_vm12, %v300_v21  ;;  %269 = vmatprep.subr.msk.mxu1 %vm43_vm12, %v300_v21 }
  0x13   :  { %253 = vmatpush3.msk.msra.mxu0 %vm43_vm12, %v300_v21  ;;  %273 = vmatpush3.msk.msra.mxu1 %vm43_vm12, %v300_v21 }
  0x14   :  { %255 = vmatmul.mubr.msk.f32.vlgmr.msra.gmra.mxu0 %vm63_vm0, %v56_v22  ;;  %261 = vmatmul.mubr.msk.f32.vlgmr.msra.gmra.mxu1 %vm63_vm0, %v60_v23 }
  0x15   :  { %257 = vmatprep.mubr.msk.f32.mxu0 %vm63_vm0, %v57_v24  ;;  %263 = vmatprep.mubr.msk.f32.mxu1 %vm63_vm0, %v61_v25 }
  0x18   :  { %258 = vmatmul.mubr.msk.f32.gmra.mxu0 %vm63_vm0, %v58_v26  ;;  %264 = vmatmul.mubr.msk.f32.gmra.mxu1 %vm63_vm0, %v62_v27 }
  0xd4   :  { %v256_v28 = vpop.f32.mrf.mxu0  ;;  %v262_v29 = vpop.f32.mrf.mxu1 }
  0xd5   :  { %195 = vst.msk [vmem:[#allocation2 + $0x8] sm:$0xff] %vm193_vm13, %v256_v28  ;;  %199 = vst.msk [vmem:[#allocation2 + $0x28] sm:$0xff] %vm193_vm13, %v262_v29 }
  0xd6   :  { %v154_v30 = vpop.f32.mrf.mxu0  ;;  %v174_v31 = vpop.f32.mrf.mxu1 }
  0xd7   :  { %194 = vst.msk [vmem:[#allocation2] sm:$0xff] %vm193_vm13, %v154_v30  ;;  %198 = vst.msk [vmem:[#allocation2 + $0x20] sm:$0xff] %vm193_vm13, %v174_v31 }
  0xd8   :  { %v259_v32 = vpop.f32.mrf.mxu0  ;;  %v265_v33 = vpop.f32.mrf.mxu1 }
  0xd9   :  { %197 = vst.msk [vmem:[#allocation2 + $0x18] sm:$0xff] %vm193_vm13, %v259_v32  ;;  %201 = vst.msk [vmem:[#allocation2 + $0x38] sm:$0xff] %vm193_vm13, %v265_v33 }
  0xda   :  { %v164_v34 = vpop.f32.mrf.mxu0  ;;  %v184_v35 = vpop.f32.mrf.mxu1 }
  0xdb   :  { %196 = vst.msk [vmem:[#allocation2 + $0x10] sm:$0xff] %vm193_vm13, %v164_v34  ;;  %200 = vst.msk [vmem:[#allocation2 + $0x30] sm:$0xff] %vm193_vm13, %v184_v35 }
  0xdc   :  { %289 = shalt.err (!%p286_p4)
}
  0xdd   :  { %s302_s24 = smov 128   ;;  %s303_s25 = smov 8  }
  0xde   :  { %213 = dma.vmem_to_hbm [thread:$0]  %s208_s23, 1024, %s358_s1, [#allocation3], %s302_s24, %s302_s24, %s303_s25  }
  0xdf   :  { %298 = dma.done.wait [#allocation3], 1024  }
  0xe0   :  { %299 = vsyncadd [#allocation3], 4294966272 }
  0xe1   :  { %217 = vsyncpa [#allocation3], 1 }

</bundles_post_ra>
